<compile_context>
chip_gen: v7x
topology: tpu7x:2x2x1
jax: 0.10.0
libtpu: 0.0.40
codegen_flags: <defaults>
</compile_context>

<pallas_src>
import functools

import jax
import jax.numpy as jnp
from jax.experimental import pallas as pl
from jax.experimental.pallas import tpu as pltpu

HIDDEN = 10      # hidden_dim in the PyTorch module
KSIZE = 3        # conv kernel size (padding=1 -> "same" length)
C_PAD = 16       # channels padded to a multiple of the 8-sublane tile
PARAM_COLS = 64  # packed parameter slab width
# Packed parameter slab (C_PAD, 64) column layout:
#   0:3   conv1 taps (multiplying x_{l-1}, x_l, x_{l+1})
#   3     b1 (folded into the ones row of the conv1 stack)
#   4:8   zeros (pads conv1 contraction K to 8)
#   8:24  conv2 tap 0  (multiplies h1_{l-1})
#   24:40 conv2 tap 1  (center)
#   40:56 conv2 tap 2  (multiplies h1_{l+1})
#   56    b2
#   57:64 zeros


def _cnn_cora_kernel(x_ref, p_ref, o_ref, *, batch, n_out):
    # x_ref: (1, N*L) f32, interleaved layout: lane l*N + n = x[n, l]
    # p_ref: (C_PAD, 64) packed parameter slab
    # o_ref: (C_PAD, n_out) -- per-batch channel maxima live in lanes 0..N-1
    nl = x_ref.shape[1]
    x = x_ref[...]                                                  # (1, NL)

    # In-kernel lane index (replaces the old lpos input DMA).
    lane = jax.lax.broadcasted_iota(jnp.int32, (1, nl), 1)
    at_left = lane < batch                    # position l == 0 within each row
    at_right = lane >= nl - batch             # position l == L - 1 within each row

    # ---- conv1 on the MXU: (C_PAD, 8) @ (8, NL) with bias folded into a ones row ----
    x_m1 = jnp.where(at_left, 0.0, pltpu.roll(x, batch, 1))         # x[l-1]
    x_p1 = jnp.where(at_right, 0.0, pltpu.roll(x, nl - batch, 1))   # x[l+1]
    ones = jnp.ones_like(x)
    zpad = jnp.zeros((4, nl), jnp.float32)
    stack1 = jnp.concatenate([x_m1, x, x_p1, ones, zpad], axis=0)   # (8, NL)
    h1 = jnp.dot(p_ref[:, 0:8], stack1, preferred_element_type=jnp.float32)
    h1 = jnp.maximum(h1, 0.0)                                       # (C_PAD, NL)

    # ---- conv2: three accumulating MXU dots (no (3*C_PAD, NL) concatenate) ----
    b2 = p_ref[:, 56:57]                                            # (C_PAD, 1)
    h2 = jnp.dot(p_ref[:, 24:40], h1, preferred_element_type=jnp.float32) + b2
    h1_m1 = jnp.where(at_left, 0.0, pltpu.roll(h1, batch, 1))       # h1[:, l-1]
    h2 = h2 + jnp.dot(p_ref[:, 8:24], h1_m1, preferred_element_type=jnp.float32)
    h1_p1 = jnp.where(at_right, 0.0, pltpu.roll(h1, nl - batch, 1)) # h1[:, l+1]
    h2 = h2 + jnp.dot(p_ref[:, 40:56], h1_p1, preferred_element_type=jnp.float32)
    h2 = jnp.maximum(h2, 0.0)                                       # (C_PAD, NL), >= 0

    # ---- global max pool: log2(L)-step segmented roll+max tree ----
    # In the interleaved layout each batch row occupies lanes {n, n+N, n+2N, ...}, so the
    # validity mask is a single global lane bound; 0.0 is a safe fill (post-ReLU values >= 0).
    pooled = h2
    s = batch
    while s < nl:
        rolled = pltpu.roll(pooled, nl - s, 1)            # rolled[:, j] = pooled[:, j + s]
        pooled = jnp.maximum(pooled, jnp.where(lane < nl - s, rolled, 0.0))
        s *= 2

    # Single lane-dense store; batch maxima are in lanes 0..N-1, rest is ignored padding.
    o_ref[...] = pooled[:, :n_out].astype(o_ref.dtype)


def cnn_for_cora(x, w1, b1, w2, b2):
    """x: (N, L) f32; weights in PyTorch Conv1d layout (O, I, K). Returns (N, HIDDEN) f32."""
    N, L = x.shape
    NL = N * L
    assert NL % 128 == 0 and NL >= 128, "flattened batch*length must be a multiple of 128"
    f32 = jnp.float32

    n_out = ((max(N, 128) + 127) // 128) * 128            # lane-dense output width
    assert n_out <= NL

    # Pack all parameters into one (C_PAD, 64) slab: one DMA instead of four tiny ones.
    P = jnp.zeros((C_PAD, PARAM_COLS), f32)
    P = P.at[:HIDDEN, 0:KSIZE].set(w1.reshape(HIDDEN, KSIZE).astype(f32))
    P = P.at[:HIDDEN, KSIZE].set(b1.astype(f32))
    for k in range(KSIZE):
        P = P.at[:HIDDEN, 8 + k * C_PAD: 8 + k * C_PAD + HIDDEN].set(w2[:, :, k].astype(f32))
    P = P.at[:HIDDEN, 8 + KSIZE * C_PAD].set(b2.astype(f32))

    # Interleaved (position-major, batch-minor) flattening: lane l*N + n holds x[n, l].
    x_flat = x.astype(f32).T.reshape(1, NL)

    kernel = functools.partial(_cnn_cora_kernel, batch=N, n_out=n_out)
    out_t = pl.pallas_call(
        kernel,
        out_shape=jax.ShapeDtypeStruct((C_PAD, n_out), f32),
        grid_spec=pltpu.PrefetchScalarGridSpec(
            num_scalar_prefetch=0,
            grid=(1,),   # whole problem in one step; VMEM use is tiny on v5e/v6e/v7x
            in_specs=[
                pl.BlockSpec((1, NL), lambda i: (0, 0)),                  # x (interleaved)
                pl.BlockSpec((C_PAD, PARAM_COLS), lambda i: (0, 0)),      # packed params
            ],
            out_specs=pl.BlockSpec((C_PAD, n_out), lambda i: (0, 0)),
        ),
        compiler_params=pltpu.CompilerParams(
            dimension_semantics=("arbitrary",),
        ),
    )(x_flat, P)

    return out_t[:HIDDEN, :N].T     # (N, HIDDEN), matches the PyTorch output layout


def _reference(x, w1, b1, w2, b2):
    """Pure-JAX reference mirroring the PyTorch forward (NCH layout)."""
    xr = x[:, None, :]                                        # (N, 1, L)
    h = jax.lax.conv_general_dilated(
        xr, w1, window_strides=(1,), padding=((1, 1),),
        dimension_numbers=("NCH", "OIH", "NCH"))
    h = jax.nn.relu(h + b1[None, :, None])
    h = jax.lax.conv_general_dilated(
        h, w2, window_strides=(1,), padding=((1, 1),),
        dimension_numbers=("NCH", "OIH", "NCH"))
    h = jax.nn.relu(h + b2[None, :, None])
    return jnp.max(h, axis=2)                                 # (N, H)


if __name__ == "__main__":
    key = jax.random.PRNGKey(0)
    k_x, k_w1, k_b1, k_w2, k_b2 = jax.random.split(key, 5)

    N, L = 16, 64                 # batch, input_dim (sequence length for Conv1d)
    x = jax.random.normal(k_x, (N, L), dtype=jnp.float32)

    # PyTorch Conv1d parameter shapes: weight (O, I, K), bias (O,)
    w1 = 0.1 * jax.random.normal(k_w1, (HIDDEN, 1, KSIZE), dtype=jnp.float32)
    b1 = 0.1 * jax.random.normal(k_b1, (HIDDEN,), dtype=jnp.float32)
    w2 = 0.1 * jax.random.normal(k_w2, (HIDDEN, HIDDEN, KSIZE), dtype=jnp.float32)
    b2 = 0.1 * jax.random.normal(k_b2, (HIDDEN,), dtype=jnp.float32)

    out = jax.block_until_ready(cnn_for_cora(x, w1, b1, w2, b2))

    ref = jax.block_until_ready(_reference(x, w1, b1, w2, b2))
    assert out.shape == (N, HIDDEN)
    assert jnp.allclose(out, ref, atol=1e-5, rtol=1e-5), (
        f"max abs err = {jnp.max(jnp.abs(out - ref))}")

    print("KERNEL_OK")
</pallas_src>

<mosaic_0001>
module attributes {stable_mosaic.version = 11 : i64} {
  func.func @_cnn_cora_kernel(%arg0: i32, %arg1: memref<1x1024xf32, #tpu.memory_space<vmem>>, %arg2: memref<16x64xf32, #tpu.memory_space<vmem>>, %arg3: memref<16x128xf32, #tpu.memory_space<vmem>>) attributes {dimension_semantics = [#tpu.dimension_semantics<arbitrary>], iteration_bounds = array<i64: 1>, scalar_prefetch = 0 : i64, scratch_operands = 0 : i64, tpu.core_type = #tpu.core_type<tc>, window_params = [{pipeline_mode = #tpu.pipeline_mode<synchronous>, transform_indices = @transform_0, window_bounds = array<i64: 1, 1024>}, {pipeline_mode = #tpu.pipeline_mode<synchronous>, transform_indices = @transform_1, window_bounds = array<i64: 16, 64>}, {pipeline_mode = #tpu.pipeline_mode<synchronous>, transform_indices = @transform_2, window_bounds = array<i64: 16, 128>}]} {
    %c0 = arith.constant 0 : index
    %c0_0 = arith.constant 0 : index
    %0 = vector.load %arg1[%c0, %c0_0] : memref<1x1024xf32, #tpu.memory_space<vmem>>, vector<1x1024xf32>
    %1 = tpu.iota {dimensions = array<i32: 1>} : vector<1x1024xi32>
    %c16_i32 = arith.constant 16 : i32
    %2 = vector.broadcast %c16_i32 : i32 to vector<1x1024xi32>
    %3 = arith.cmpi slt, %1, %2 : vector<1x1024xi32>
    %c1008_i32 = arith.constant 1008 : i32
    %4 = vector.broadcast %c1008_i32 : i32 to vector<1x1024xi32>
    %5 = arith.cmpi sge, %1, %4 : vector<1x1024xi32>
    %c16_i32_1 = arith.constant 16 : i32
    %6 = tpu.dynamic_rotate %0 by %c16_i32_1 dim 1 : vector<1x1024xf32>, i32 -> vector<1x1024xf32>
    %cst = arith.constant 0.000000e+00 : f32
    %7 = vector.broadcast %cst : f32 to vector<1x1024xf32>
    %8 = arith.select %3, %7, %6 : vector<1x1024xi1>, vector<1x1024xf32>
    %c1008_i32_2 = arith.constant 1008 : i32
    %9 = tpu.dynamic_rotate %0 by %c1008_i32_2 dim 1 : vector<1x1024xf32>, i32 -> vector<1x1024xf32>
    %cst_3 = arith.constant 0.000000e+00 : f32
    %10 = vector.broadcast %cst_3 : f32 to vector<1x1024xf32>
    %11 = arith.select %5, %10, %9 : vector<1x1024xi1>, vector<1x1024xf32>
    %cst_4 = arith.constant 1.000000e+00 : f32
    %12 = vector.broadcast %cst_4 : f32 to vector<1x1024xf32>
    %cst_5 = arith.constant 0.000000e+00 : f32
    %13 = vector.broadcast %cst_5 : f32 to vector<4x1024xf32>
    %14 = tpu.concatenate %8, %0, %11, %12, %13 in 0 : vector<1x1024xf32>, vector<1x1024xf32>, vector<1x1024xf32>, vector<1x1024xf32>, vector<4x1024xf32> -> vector<8x1024xf32>
    %c0_6 = arith.constant 0 : index
    %c0_7 = arith.constant 0 : index
    %15 = vector.load %arg2[%c0_6, %c0_7] : memref<16x64xf32, #tpu.memory_space<vmem>>, vector<16x8xf32>
    %cst_8 = arith.constant dense<0.000000e+00> : vector<16x1024xf32>
    %16 = tpu.matmul %15, %14, %cst_8 {dimension_numbers = #tpu.dot_dimension_numbers<[1], [0], [0], [1], [0, 0, 1, 1], [], []>} : vector<16x8xf32>, vector<8x1024xf32>, vector<16x1024xf32> -> vector<16x1024xf32>
    %cst_9 = arith.constant 0.000000e+00 : f32
    %17 = vector.broadcast %cst_9 : f32 to vector<16x1024xf32>
    %18 = arith.maximumf %16, %17 : vector<16x1024xf32>
    %c0_10 = arith.constant 0 : index
    %c56 = arith.constant 56 : index
    %19 = vector.load %arg2[%c0_10, %c56] : memref<16x64xf32, #tpu.memory_space<vmem>>, vector<16x1xf32>
    %c0_11 = arith.constant 0 : index
    %c24 = arith.constant 24 : index
    %20 = vector.load %arg2[%c0_11, %c24] : memref<16x64xf32, #tpu.memory_space<vmem>>, vector<16x16xf32>
    %cst_12 = arith.constant dense<0.000000e+00> : vector<16x1024xf32>
    %21 = tpu.matmul %20, %18, %cst_12 {dimension_numbers = #tpu.dot_dimension_numbers<[1], [0], [0], [1], [0, 0, 1, 1], [], []>} : vector<16x16xf32>, vector<16x1024xf32>, vector<16x1024xf32> -> vector<16x1024xf32>
    %22 = vector.broadcast %19 : vector<16x1xf32> to vector<16x1024xf32>
    %23 = arith.addf %21, %22 : vector<16x1024xf32>
    %c16_i32_13 = arith.constant 16 : i32
    %24 = tpu.dynamic_rotate %18 by %c16_i32_13 dim 1 : vector<16x1024xf32>, i32 -> vector<16x1024xf32>
    %cst_14 = arith.constant 0.000000e+00 : f32
    %25 = vector.shape_cast %3 : vector<1x1024xi1> to vector<1x1024xi1>
    %26 = vector.broadcast %25 : vector<1x1024xi1> to vector<16x1024xi1>
    %27 = vector.broadcast %cst_14 : f32 to vector<16x1024xf32>
    %28 = arith.select %26, %27, %24 : vector<16x1024xi1>, vector<16x1024xf32>
    %c0_15 = arith.constant 0 : index
    %c8 = arith.constant 8 : index
    %29 = vector.load %arg2[%c0_15, %c8] : memref<16x64xf32, #tpu.memory_space<vmem>>, vector<16x16xf32>
    %cst_16 = arith.constant dense<0.000000e+00> : vector<16x1024xf32>
    %30 = tpu.matmul %29, %28, %cst_16 {dimension_numbers = #tpu.dot_dimension_numbers<[1], [0], [0], [1], [0, 0, 1, 1], [], []>} : vector<16x16xf32>, vector<16x1024xf32>, vector<16x1024xf32> -> vector<16x1024xf32>
    %31 = arith.addf %23, %30 : vector<16x1024xf32>
    %c1008_i32_17 = arith.constant 1008 : i32
    %32 = tpu.dynamic_rotate %18 by %c1008_i32_17 dim 1 : vector<16x1024xf32>, i32 -> vector<16x1024xf32>
    %cst_18 = arith.constant 0.000000e+00 : f32
    %33 = vector.shape_cast %5 : vector<1x1024xi1> to vector<1x1024xi1>
    %34 = vector.broadcast %33 : vector<1x1024xi1> to vector<16x1024xi1>
    %35 = vector.broadcast %cst_18 : f32 to vector<16x1024xf32>
    %36 = arith.select %34, %35, %32 : vector<16x1024xi1>, vector<16x1024xf32>
    %c0_19 = arith.constant 0 : index
    %c40 = arith.constant 40 : index
    %37 = vector.load %arg2[%c0_19, %c40] : memref<16x64xf32, #tpu.memory_space<vmem>>, vector<16x16xf32>
    %cst_20 = arith.constant dense<0.000000e+00> : vector<16x1024xf32>
    %38 = tpu.matmul %37, %36, %cst_20 {dimension_numbers = #tpu.dot_dimension_numbers<[1], [0], [0], [1], [0, 0, 1, 1], [], []>} : vector<16x16xf32>, vector<16x1024xf32>, vector<16x1024xf32> -> vector<16x1024xf32>
    %39 = arith.addf %31, %38 : vector<16x1024xf32>
    %cst_21 = arith.constant 0.000000e+00 : f32
    %40 = vector.broadcast %cst_21 : f32 to vector<16x1024xf32>
    %41 = arith.maximumf %39, %40 : vector<16x1024xf32>
    %c1008_i32_22 = arith.constant 1008 : i32
    %42 = tpu.dynamic_rotate %41 by %c1008_i32_22 dim 1 : vector<16x1024xf32>, i32 -> vector<16x1024xf32>
    %c1008_i32_23 = arith.constant 1008 : i32
    %43 = vector.broadcast %c1008_i32_23 : i32 to vector<1x1024xi32>
    %44 = arith.cmpi slt, %1, %43 : vector<1x1024xi32>
    %cst_24 = arith.constant 0.000000e+00 : f32
    %45 = vector.shape_cast %44 : vector<1x1024xi1> to vector<1x1024xi1>
    %46 = vector.broadcast %45 : vector<1x1024xi1> to vector<16x1024xi1>
    %47 = vector.broadcast %cst_24 : f32 to vector<16x1024xf32>
    %48 = arith.select %46, %42, %47 : vector<16x1024xi1>, vector<16x1024xf32>
    %49 = arith.maximumf %41, %48 : vector<16x1024xf32>
    %c992_i32 = arith.constant 992 : i32
    %50 = tpu.dynamic_rotate %49 by %c992_i32 dim 1 : vector<16x1024xf32>, i32 -> vector<16x1024xf32>
    %c992_i32_25 = arith.constant 992 : i32
    %51 = vector.broadcast %c992_i32_25 : i32 to vector<1x1024xi32>
    %52 = arith.cmpi slt, %1, %51 : vector<1x1024xi32>
    %cst_26 = arith.constant 0.000000e+00 : f32
    %53 = vector.shape_cast %52 : vector<1x1024xi1> to vector<1x1024xi1>
    %54 = vector.broadcast %53 : vector<1x1024xi1> to vector<16x1024xi1>
    %55 = vector.broadcast %cst_26 : f32 to vector<16x1024xf32>
    %56 = arith.select %54, %50, %55 : vector<16x1024xi1>, vector<16x1024xf32>
    %57 = arith.maximumf %49, %56 : vector<16x1024xf32>
    %c960_i32 = arith.constant 960 : i32
    %58 = tpu.dynamic_rotate %57 by %c960_i32 dim 1 : vector<16x1024xf32>, i32 -> vector<16x1024xf32>
    %c960_i32_27 = arith.constant 960 : i32
    %59 = vector.broadcast %c960_i32_27 : i32 to vector<1x1024xi32>
    %60 = arith.cmpi slt, %1, %59 : vector<1x1024xi32>
    %cst_28 = arith.constant 0.000000e+00 : f32
    %61 = vector.shape_cast %60 : vector<1x1024xi1> to vector<1x1024xi1>
    %62 = vector.broadcast %61 : vector<1x1024xi1> to vector<16x1024xi1>
    %63 = vector.broadcast %cst_28 : f32 to vector<16x1024xf32>
    %64 = arith.select %62, %58, %63 : vector<16x1024xi1>, vector<16x1024xf32>
    %65 = arith.maximumf %57, %64 : vector<16x1024xf32>
    %c896_i32 = arith.constant 896 : i32
    %66 = tpu.dynamic_rotate %65 by %c896_i32 dim 1 : vector<16x1024xf32>, i32 -> vector<16x1024xf32>
    %c896_i32_29 = arith.constant 896 : i32
    %67 = vector.broadcast %c896_i32_29 : i32 to vector<1x1024xi32>
    %68 = arith.cmpi slt, %1, %67 : vector<1x1024xi32>
    %cst_30 = arith.constant 0.000000e+00 : f32
    %69 = vector.shape_cast %68 : vector<1x1024xi1> to vector<1x1024xi1>
    %70 = vector.broadcast %69 : vector<1x1024xi1> to vector<16x1024xi1>
    %71 = vector.broadcast %cst_30 : f32 to vector<16x1024xf32>
    %72 = arith.select %70, %66, %71 : vector<16x1024xi1>, vector<16x1024xf32>
    %73 = arith.maximumf %65, %72 : vector<16x1024xf32>
    %c768_i32 = arith.constant 768 : i32
    %74 = tpu.dynamic_rotate %73 by %c768_i32 dim 1 : vector<16x1024xf32>, i32 -> vector<16x1024xf32>
    %c768_i32_31 = arith.constant 768 : i32
    %75 = vector.broadcast %c768_i32_31 : i32 to vector<1x1024xi32>
    %76 = arith.cmpi slt, %1, %75 : vector<1x1024xi32>
    %cst_32 = arith.constant 0.000000e+00 : f32
    %77 = vector.shape_cast %76 : vector<1x1024xi1> to vector<1x1024xi1>
    %78 = vector.broadcast %77 : vector<1x1024xi1> to vector<16x1024xi1>
    %79 = vector.broadcast %cst_32 : f32 to vector<16x1024xf32>
    %80 = arith.select %78, %74, %79 : vector<16x1024xi1>, vector<16x1024xf32>
    %81 = arith.maximumf %73, %80 : vector<16x1024xf32>
    %c512_i32 = arith.constant 512 : i32
    %82 = tpu.dynamic_rotate %81 by %c512_i32 dim 1 : vector<16x1024xf32>, i32 -> vector<16x1024xf32>
    %c512_i32_33 = arith.constant 512 : i32
    %83 = vector.broadcast %c512_i32_33 : i32 to vector<1x1024xi32>
    %84 = arith.cmpi slt, %1, %83 : vector<1x1024xi32>
    %cst_34 = arith.constant 0.000000e+00 : f32
    %85 = vector.shape_cast %84 : vector<1x1024xi1> to vector<1x1024xi1>
    %86 = vector.broadcast %85 : vector<1x1024xi1> to vector<16x1024xi1>
    %87 = vector.broadcast %cst_34 : f32 to vector<16x1024xf32>
    %88 = arith.select %86, %82, %87 : vector<16x1024xi1>, vector<16x1024xf32>
    %89 = arith.maximumf %81, %88 : vector<16x1024xf32>
    %90 = vector.extract_strided_slice %89 {offsets = [0, 0], sizes = [16, 128], strides = [1, 1]} : vector<16x1024xf32> to vector<16x128xf32>
    %c0_35 = arith.constant 0 : index
    %c0_36 = arith.constant 0 : index
    %91 = vector.load %arg3[%c0_35, %c0_36] : memref<16x128xf32, #tpu.memory_space<vmem>>, vector<16x128xf32>
    tpu.vector_store %arg3[%c0_35, %c0_36], %90 {strides = array<i32>} : memref<16x128xf32, #tpu.memory_space<vmem>>, vector<16x128xf32>,
    return
  }
  func.func @transform_0(%arg0: i32) -> (i32, i32) {
    %c0_i32 = arith.constant 0 : i32
    %c0_i32_0 = arith.constant 0 : i32
    %c0_i32_1 = arith.constant 0 : i32
    return %c0_i32, %c0_i32_0 : i32, i32
  }
  func.func @transform_1(%arg0: i32) -> (i32, i32) {
    %c0_i32 = arith.constant 0 : i32
    %c0_i32_0 = arith.constant 0 : i32
    %c0_i32_1 = arith.constant 0 : i32
    return %c0_i32, %c0_i32_0 : i32, i32
  }
  func.func @transform_2(%arg0: i32) -> (i32, i32) {
    %c0_i32 = arith.constant 0 : i32
    %c0_i32_0 = arith.constant 0 : i32
    %c0_i32_1 = arith.constant 0 : i32
    return %c0_i32, %c0_i32_0 : i32, i32
  }
}

</mosaic_0001>

<bundles_post_ra>
// kernel: tpu_custom_call.1
= control target key start
LH: loop header
LB: loop body
LE: loop exit
PB: predicated region body
PF: predicated region fallthrough
CT: control target
= control target key end

     0   :  { %7 = vsyncpa [#allocation3], 0  ;;  %s3187_s0 = inlined_call_operand.hbm [shape: f32[1,1024], index: 0, kind: input, shape index: {}]   ;;  %s3188_s1 = inlined_call_operand.hbm [shape: f32[16,64], index: 1, kind: input, shape index: {}]   ;;  %s3189_s2 = inlined_call_operand.hbm [shape: f32[16,128], index: 2, kind: output, shape index: {}]  }
   0x1   :  { %8 = vsyncpa [#allocation6], 0 }
   0x2   :  { %9 = vsyncpa [#allocation4], 0  ;;  %s2425_s9 = smov [#allocation2]   ;;  %s2426_s11 = smov [#allocation5]  }
   0x3   :  { %s16_s10 = sshll.u32 %s2425_s9, 4  ;;  %s25_s12 = sshll.u32 %s2426_s11, 4  ;;  %s17_s10 = int_to_ptr.vmem [resolvable:$true] %s16_s10  ;;  %s2454_s12 = int_to_ptr.vmem [resolvable:$true] %s25_s12 }
   0x4   :  { %s2353_s15 = scalar_lea.hbm %s3187_s0, 128 }
   0x5   :  { %p2354_p0 = scmp.ne.s32.totalorder %s3187_s0, %s2353_s15  ;;  %p2357_p1 = scmp.lt.u32.totalorder %s2353_s15, %s3187_s0 }
   0x7   :  { %p2359_p2 = pnand %p2357_p1, %p2354_p0 }
   0x9   :  { %2362 = shalt.err (!%p2359_p2)
}
   0xa   :  { %s2363_s20 = scalar_lea.vmem %s17_s10, 128  ;;  %p2368_p4 = scmp.lt.s32.totalorder %s17_s10, %s17_s10 }
   0xb   :  { %p2364_p3 = scmp.ne.s32.totalorder %s17_s10, %s2363_s20  ;;  %p2369_p5 = scmp.lt.s32.totalorder %s2363_s20, %s2363_s20 }
   0xd   :  { %p2370_p6 = por %p2369_p5, %p2368_p4 }
   0xf   :  { %p2371_p7 = pnand %p2370_p6, %p2364_p3 }
  0x11   :  { %2374 = shalt.err (!%p2371_p7)
}
  0x12   :  { %19 = dma.hbm_to_vmem [thread:$0]  %s3187_s0, 128, %s17_s10, [#allocation3]  }
  0x13   :  { %s2375_s25 = scalar_lea.hbm %s3188_s1, 256 }
  0x14   :  { %p2376_p8 = scmp.ne.s32.totalorder %s3188_s1, %s2375_s25  ;;  %p2379_p9 = scmp.lt.u32.totalorder %s2375_s25, %s3188_s1 }
  0x16   :  { %p2381_p10 = pnand %p2379_p9, %p2376_p8 }
  0x18   :  { %2384 = shalt.err (!%p2381_p10)
}
  0x19   :  { %s2385_s30 = scalar_lea.vmem %s2454_s12, 256  ;;  %p2390_p12 = scmp.lt.s32.totalorder %s2454_s12, %s2454_s12 }
  0x1a   :  { %p2386_p11 = scmp.ne.s32.totalorder %s2454_s12, %s2385_s30  ;;  %p2391_p13 = scmp.lt.s32.totalorder %s2385_s30, %s2385_s30 }
  0x1c   :  { %p2392_p0 = por %p2391_p13, %p2390_p12 }
  0x1e   :  { %p2393_p1 = pnand %p2392_p0, %p2386_p11 }
  0x20   :  { %2396 = shalt.err (!%p2393_p1)
}
  0x21   :  { %s2427_s0 = smov 128   ;;  %s2428_s3 = smov 8  }
  0x22   :  { %31 = dma.hbm_to_vmem [thread:$0]  %s3188_s1, 256, %s2454_s12, [#allocation6], %s2427_s0, %s2427_s0, %s2428_s3  }
  0x23   :  { %2419 = dma.done.wait [#allocation3], 128  }
  0x24   :  { %2420 = vsyncadd [#allocation3], 4294967168 }
  0x25   :  { %2421 = dma.done.wait [#allocation6], 256  }
  0x26   :  { %2422 = vsyncadd [#allocation6], 4294967040  ;;  %v39_v0 = vlaneseq  ;;  %v38_v5 = vld [vmem:[#allocation2] sm:$0xff]  ;;  %s2429_s6 = smov 112   ;;  %s2430_s7 = smov 16   ;;  %v2431_v10 = vmov 0.0  }
  0x27   :  { %380 = vmatprep.mubr.f32.mxu1 %v2431_v10  ;;  %303 = vmatprep.mubr.f32.mxu0 %v2431_v10  ;;  %v2526_v20 = vld [vmem:[#allocation5] sm:$0xff]  ;;  %v2528_v21 = vld [vmem:[#allocation5 + $0x8] sm:$0xff]  ;;  %s2432_s1 = smov 104   ;;  %vm194_vm2 = vcmask 1040384   ;;  %vm203_vm3 = vcmask 1041408   ;;  %vm212_vm4 = vcmask 1042432  }
  0x28   :  { %v66_v1 = vshrl.u32 %v39_v0, 7  ;;  %v2532_v22 = vand.u32 127, %v39_v0  ;;  %vm221_vm5 = vcmask 1043456   ;;  %vm232_vm6 = vcmask 64512   ;;  %s2433_s8 = smov 120   ;;  %s2434_s9 = smov 88  }
  0x29   :  { %vm575_vm8 = vcmask 130048   ;;  %s2436_s10 = smov 96   ;;  %s2437_s11 = smov 64  }
  0x2a   :  { %v79_v2 = vsub.s32 3, %v66_v1  ;;  %v75_v3 = vsub.s32 2, %v66_v1  ;;  %v83_v4 = vsub.s32 4, %v66_v1  ;;  %v71_v9 = vsub.s32 1, %v66_v1  ;;  %s2438_s12 = smov [#allocation7]  }
  0x2b   :  { %v67_v12 = vsub.s32 0, %v66_v1  ;;  %v95_v14 = vsub.s32 7, %v66_v1  ;;  %v91_v16 = vsub.s32 6, %v66_v1  ;;  %v87_v18 = vsub.s32 5, %v66_v1  ;;  %s2098_s13 = sshll.u32 %s2438_s12, 4  ;;  %s2099_s13 = int_to_ptr.vmem [resolvable:$true] %s2098_s13 }
  0x2c   :  { %v80_v6 = vrot.slane %v38_v5, %v79_v2  ;;  %v76_v7 = vrot.slane %v38_v5, %v75_v3  ;;  %v2490_v8 = vrot.slane %v38_v5, %v83_v4  ;;  %v72_v11 = vrot.slane %v38_v5, %v71_v9  ;;  %s2397_s14 = scalar_lea.vmem %s2099_s13, 256  ;;  %p2402_p3 = scmp.lt.s32.totalorder %s2099_s13, %s2099_s13 }
  0x2d   :  { %v2499_v13 = vrot.slane %v38_v5, %v67_v12  ;;  %v2504_v15 = vrot.slane %v38_v5, %v95_v14  ;;  %v2510_v17 = vrot.slane %v38_v5, %v91_v16  ;;  %v2516_v19 = vrot.slane %v38_v5, %v87_v18  ;;  %p2398_p2 = scmp.ne.s32.totalorder %s2099_s13, %s2397_s14  ;;  %p2403_p4 = scmp.lt.s32.totalorder %s2397_s14, %s2397_s14 }
  0x2e   :  { %143 = vrot.lane.b32.xlu0 %v80_v6, %s2429_s6  ;;  %109 = vrot.lane.b32.xlu1 %v76_v7, %s2430_s7  ;;  %vm48_vm0 = vcmp.lt.s32.totalorder %v2532_v22, 16  ;;  %vm153_vm1 = vcmp.lt.s32.totalorder %v2532_v22, 112  ;;  %v2566_v47 = vadd.s32 896, %v2532_v22  ;;  %vm1864_vm14 = vcmp.lt.s32.totalorder %v2532_v22, 96 }
  0x2f   :  { %vm2713_vm9 = vmneg %vm48_vm0  ;;  %p2404_p5 = por %p2403_p4, %p2402_p3 }
  0x30   :  { %vm63_vm7 = vcmp.ge.s32.totalorder %v2566_v47, 1008  ;;  %vm2178_vm10 = vmpackc.low %vm2713_vm9, %vm2713_vm9  ;;  %vm1783_vm13 = vcmp.lt.s32.totalorder %v2566_v47, 1008  ;;  %vm1888_vm15 = vcmp.lt.s32.totalorder %v2566_v47, 992 }
  0x31   :  { %vm2787_vm11 = vmneg %vm63_vm7  ;;  %p2405_p6 = pnand %p2404_p5, %p2398_p2 }
  0x32   :  { %145 = vrot.lane.b32.xlu0 %v2490_v8, %s2429_s6  ;;  %111 = vrot.lane.b32.xlu1 %v80_v6, %s2430_s7  ;;  %vm2205_vm12 = vmpackc.low %vm2787_vm11, %vm2787_vm11 }
  0x36   :  { %141 = vrot.lane.b32.xlu0 %v76_v7, %s2429_s6  ;;  %107 = vrot.lane.b32.xlu1 %v72_v11, %s2430_s7 }
  0x3a   :  { %139 = vrot.lane.b32.xlu0 %v72_v11, %s2429_s6  ;;  %105 = vrot.lane.b32.xlu1 %v2499_v13, %s2430_s7 }
  0x3e   :  { %119 = vrot.lane.b32.xlu0 %v2504_v15, %s2430_s7  ;;  %137 = vrot.lane.b32.xlu1 %v2499_v13, %s2429_s6 }
  0x42   :  { %151 = vrot.lane.b32.xlu0 %v2504_v15, %s2429_s6  ;;  %117 = vrot.lane.b32.xlu1 %v2510_v17, %s2430_s7 }
  0x46   :  { %149 = vrot.lane.b32.xlu0 %v2510_v17, %s2429_s6  ;;  %115 = vrot.lane.b32.xlu1 %v2516_v19, %s2430_s7 }
  0x4a   :  { %147 = vrot.lane.b32.xlu0 %v2516_v19, %s2429_s6  ;;  %113 = vrot.lane.b32.xlu1 %v2490_v8, %s2430_s7 }
  0x4e   :  { %571 = vrot.lane.b32.xlu0 %v2526_v20, %s2432_s1  ;;  %573 = vrot.lane.b32.xlu1 %v2528_v21, %s2432_s1 }
  0x52   :  { %968 = vrot.lane.b32.xlu1 %v2526_v20, %s2433_s8 }
  0xa0   :  { %v144_v23 = vpop.permute.xlu0 %143  ;;  %v110_v24 = vpop.permute.xlu1 %109 }
  0xa4   :  { %v2536_v25 = vpop.permute.xlu0 %145  ;;  %v2538_v26 = vpop.permute.xlu1 %111 }
  0xa5   :  { %v157_v27 = vsel %vm153_vm1, %v144_v23, %v2536_v25  ;;  %v125_v28 = vsel %vm48_vm0, %v110_v24, %v2538_v26 }
  0xa6   :  { %v181_v29 = vrot.slane %v157_v27, 6  ;;  %v198_v30 = vsel %vm194_vm2, %v125_v28, %v80_v6 }
  0xa8   :  { %v142_v31 = vpop.permute.xlu0 %141  ;;  %v108_v32 = vpop.permute.xlu1 %107  ;;  %v207_v33 = vsel %vm203_vm3, %v198_v30, %v181_v29 }
  0xa9   :  { %v158_v34 = vsel %vm153_vm1, %v142_v31, %v144_v23  ;;  %v126_v35 = vsel %vm48_vm0, %v108_v32, %v110_v24  ;;  %v216_v36 = vsel %vm212_vm4, %v207_v33, 1.0 }
  0xaa   :  { %v180_v37 = vrot.slane %v158_v34, 6  ;;  %v197_v38 = vsel %vm194_vm2, %v126_v35, %v76_v7  ;;  %2115 = vmatprep.subr.msk.mxu1 %vm221_vm5, %v216_v36 }
  0xac   :  { %v140_v39 = vpop.permute.xlu0 %139  ;;  %v106_v40 = vpop.permute.xlu1 %105  ;;  %v206_v41 = vsel %vm203_vm3, %v197_v38, %v180_v37 }
  0xad   :  { %v159_v42 = vsel %vm153_vm1, %v140_v39, %v142_v31  ;;  %v127_v43 = vsel %vm48_vm0, %v106_v40, %v108_v32  ;;  %v215_v44 = vsel %vm212_vm4, %v206_v41, 1.0 }
  0xae   :  { %v179_v45 = vrot.slane %v159_v42, 6  ;;  %2116 = vmatpush1.msk.msra.mxu1 %vm221_vm5, %v215_v44  ;;  %v196_v46 = vsel %vm194_vm2, %v127_v43, %v72_v11 }
  0xaf   :  { %2117 = vmatmul.mubr.msk.f32.vlgmr.msra.gmra.mrb[0].mxu1 %vm232_vm6, %v2526_v20 }
  0xb0   :  { %v120_v48 = vpop.permute.xlu0 %119  ;;  %v138_v49 = vpop.permute.xlu1 %137  ;;  %v205_v50 = vsel %vm203_vm3, %v196_v46, %v179_v45  ;;  %386 = vmatprep.mubr.f32.mxu1 %v2431_v10 }
  0xb1   :  { %v128_v51 = vsel %vm48_vm0, %v120_v48, %v106_v40  ;;  %v160_v52 = vsel %vm153_vm1, %v138_v49, %v140_v39  ;;  %v214_v53 = vsel %vm212_vm4, %v205_v50, 1.0 }
  0xb2   :  { %v129_v54 = vsel %vm48_vm0, 0.0, %v128_v51  ;;  %v178_v55 = vrot.slane %v160_v52, 6  ;;  %2111 = vmatprep.subr.msk.mxu0 %vm221_vm5, %v214_v53 }
  0xb3   :  { %v195_v56 = vsel %vm194_vm2, %v129_v54, %v2499_v13  ;;  %2118 = vmatmul.mubr.msk.f32.gmra.mrb[2].mxu1 %vm232_vm6, %v2528_v21 }
  0xb4   :  { %v152_v57 = vpop.permute.xlu0 %151  ;;  %v118_v58 = vpop.permute.xlu1 %117  ;;  %v204_v59 = vsel %vm203_vm3, %v195_v56, %v178_v55  ;;  %534 = vmatprep.mubr.f32.mxu1 %v2431_v10 }
  0xb5   :  { %v161_v60 = vsel %vm153_vm1, %v152_v57, %v138_v49  ;;  %v121_v61 = vsel %vm48_vm0, %v118_v58, %v120_v48  ;;  %v213_v62 = vsel %vm212_vm4, %v204_v59, 1.0 }
  0xb6   :  { %v169_v63 = vsel %vm63_vm7, 0.0, %v161_v60  ;;  %2112 = vmatpush1.msk.msra.mxu0 %vm221_vm5, %v213_v62  ;;  %v202_v1 = vsel %vm194_vm2, %v121_v61, %v2504_v15 }
  0xb7   :  { %v185_v0 = vrot.slane %v169_v63, 6  ;;  %2113 = vmatmul.mubr.msk.f32.vlgmr.msra.gmra.mrb[0].mxu0 %vm232_vm6, %v2526_v20 }
  0xb8   :  { %v150_v2 = vpop.permute.xlu0 %149  ;;  %v116_v3 = vpop.permute.xlu1 %115  ;;  %309 = vmatprep.mubr.f32.mxu0 %v2431_v10 }
  0xb9   :  { %v154_v4 = vsel %vm153_vm1, %v150_v2, %v152_v57  ;;  %v122_v5 = vsel %vm48_vm0, %v116_v3, %v118_v58  ;;  %v211_v6 = vsel %vm203_vm3, %v202_v1, %v185_v0 }
  0xba   :  { %v184_v7 = vrot.slane %v154_v4, 6  ;;  %v201_v9 = vsel %vm194_vm2, %v122_v5, %v2510_v17  ;;  %v220_v11 = vsel %vm212_vm4, %v211_v6, 1.0 }
  0xbb   :  { %2114 = vmatmul.mubr.msk.f32.gmra.mrb[2].mxu0 %vm232_vm6, %v2528_v21  ;;  %2123 = vmatprep.subr.msk.mxu1 %vm221_vm5, %v220_v11 }
  0xbc   :  { %v210_v12 = vsel %vm203_vm3, %v201_v9, %v184_v7  ;;  %v148_v13 = vpop.permute.xlu0 %147  ;;  %v114_v14 = vpop.permute.xlu1 %113  ;;  %457 = vmatprep.mubr.f32.mxu0 %v2431_v10 }
  0xbd   :  { %v155_v15 = vsel %vm153_vm1, %v148_v13, %v150_v2  ;;  %v156_v16 = vsel %vm153_vm1, %v2536_v25, %v148_v13  ;;  %v123_v17 = vsel %vm48_vm0, %v114_v14, %v116_v3  ;;  %v124_v18 = vsel %vm48_vm0, %v2538_v26, %v114_v14 }
  0xbe   :  { %v182_v23 = vrot.slane %v156_v16, 6  ;;  %v183_v24 = vrot.slane %v155_v15, 6  ;;  %v199_v27 = vsel %vm194_vm2, %v124_v18, %v2490_v8  ;;  %v200_v28 = vsel %vm194_vm2, %v123_v17, %v2516_v19 }
  0xbf   :  { %v219_v29 = vsel %vm212_vm4, %v210_v12, 1.0 }
  0xc0   :  { %v208_v30 = vsel %vm203_vm3, %v199_v27, %v182_v23  ;;  %2124 = vmatpush1.msk.msra.mxu1 %vm221_vm5, %v219_v29  ;;  %v209_v25 = vsel %vm203_vm3, %v200_v28, %v183_v24  ;;  %v572_v45 = vpop.permute.xlu0 %571  ;;  %v574_v56 = vpop.permute.xlu1 %573  ;;  %v2435_v23 = vmov 56  }
  0xc1   :  { %2125 = vmatmul.mubr.msk.f32.vlgmr.msra.gmra.mrb[4].mxu1 %vm232_vm6, %v2526_v20  ;;  %v218_v26 = vsel %vm212_vm4, %v209_v25, 1.0  ;;  %v217_v31 = vsel %vm212_vm4, %v208_v30, 1.0  ;;  %2351 = vset.pattern.permute.xlu0 %v2435_v23 }
  0xc2   :  { %2119 = vmatprep.subr.msk.mxu0 %vm221_vm5, %v218_v26  ;;  %540 = vmatprep.mubr.f32.mxu1 %v2431_v10 }
  0xc3   :  { %2120 = vmatpush1.msk.msra.mxu0 %vm221_vm5, %v217_v31  ;;  %2352 = vset.pattern.permute.xlu1 %v2435_v23 }
  0xc4   :  { %2121 = vmatmul.mubr.msk.f32.vlgmr.msra.gmra.mrb[4].mxu0 %vm232_vm6, %v2526_v20  ;;  %v2693_v24 = vpop.permute.xlu1 %968 }
  0xc5   :  { %2126 = vmatmul.mubr.msk.f32.gmra.mrb[6].mxu1 %vm232_vm6, %v2528_v21  ;;  %463 = vmatprep.mubr.f32.mxu0 %v2431_v10 }
  0xc6   :  { %721 = vmatprep.mubr.f32.mxu1 %v2431_v10 }
  0xc8   :  { %2122 = vmatmul.mubr.msk.f32.gmra.mrb[6].mxu0 %vm232_vm6, %v2528_v21 }
  0xc9   :  { %644 = vmatprep.mubr.f32.mxu0 %v2431_v10 }
 0x182   :  { %v382_v8 = vpop.f32.mrb[0].mxu1 }
 0x183   :  { %v384_v19 = vpop.f32.mrb[1].mxu1  ;;  %v549_v32 = vmax.f32 %v382_v8, 0.0 }
 0x184   :  { %v550_v33 = vmax.f32 %v384_v19, 0.0 }
 0x186   :  { %v388_v34 = vpop.f32.mrb[2].mxu1 }
 0x187   :  { %v557_v35 = vmax.f32 %v388_v34, 0.0  ;;  %v390_v36 = vpop.f32.mrb[3].mxu1 }
 0x188   :  { %v558_v37 = vmax.f32 %v390_v36, 0.0 }
 0x189   :  { %v2165_v38 = vpack.c.bf16 %v557_v35, %v549_v32  ;;  %v2647_v39 = vpack.i.bf16 %v557_v35, %v549_v32 }
 0x18a   :  { %v305_v40 = vpop.f32.mrb[0].mxu0  ;;  %v2163_v41 = vpack.c.bf16 %v558_v37, %v550_v33  ;;  %v2649_v42 = vpack.i.bf16 %v558_v37, %v550_v33 }
 0x18b   :  { %v307_v43 = vpop.f32.mrb[1].mxu0  ;;  %2272 = vrot.lane.b32.xlu0 %v2647_v39, %s2430_s7  ;;  %v547_v44 = vmax.f32 %v305_v40, 0.0 }
 0x18c   :  { %2164 = vmatprep.subr.bf16.mxu1 %v2163_v41  ;;  %v548_v50 = vmax.f32 %v307_v43, 0.0 }
 0x18d   :  { %2166 = vmatpush1.bf16.msra.mxu1 %v2165_v38 }
 0x18e   :  { %v311_v46 = vpop.f32.mrb[2].mxu0 }
 0x18f   :  { %v555_v48 = vmax.f32 %v311_v46, 0.0  ;;  %v313_v49 = vpop.f32.mrb[3].mxu0 }
 0x190   :  { %v556_v51 = vmax.f32 %v313_v49, 0.0  ;;  %2129 = vmatmul.mubr.msk.f32.vlgmr.msra.gmra.mrb[8].mxu1 %vm575_vm8, %v572_v45 }
 0x191   :  { %v2161_v52 = vpack.c.bf16 %v555_v48, %v547_v44  ;;  %v2276_v53 = vpack.i.bf16 %v555_v48, %v547_v44  ;;  %727 = vmatprep.mubr.f32.mxu1 %v2431_v10 }
 0x192   :  { %v2286_v54 = vpack.i.bf16 %v556_v51, %v548_v50  ;;  %v2159_v55 = vpack.c.bf16 %v556_v51, %v548_v50 }
 0x193   :  { %2277 = vrot.lane.b32.xlu1 %v2276_v53, %s2430_s7 }
 0x194   :  { %v536_v57 = vpop.f32.mrb[4].mxu1  ;;  %2287 = vrot.lane.b32.xlu0 %v2286_v54, %s2430_s7  ;;  %2160 = vmatprep.subr.bf16.mxu0 %v2159_v55 }
 0x195   :  { %v538_v58 = vpop.f32.mrb[5].mxu1  ;;  %2162 = vmatpush1.bf16.msra.mxu0 %v2161_v52  ;;  %2130 = vmatmul.mubr.msk.f32.gmra.mrb[10].mxu1 %vm575_vm8, %v574_v56  ;;  %v553_v62 = vmax.f32 %v536_v57, 0.0 }
 0x196   :  { %875 = vmatprep.mubr.f32.mxu1 %v2431_v10  ;;  %v554_v1 = vmax.f32 %v538_v58, 0.0 }
 0x197   :  { %2282 = vrot.lane.b32.xlu1 %v2649_v42, %s2430_s7  ;;  %v459_v59 = vpop.f32.mrb[4].mxu0 }
 0x198   :  { %v542_v60 = vpop.f32.mrb[6].mxu1  ;;  %v461_v61 = vpop.f32.mrb[5].mxu0  ;;  %2127 = vmatmul.mubr.msk.f32.vlgmr.msra.gmra.mrb[8].mxu0 %vm575_vm8, %v572_v45  ;;  %v551_v4 = vmax.f32 %v459_v59, 0.0 }
 0x199   :  { %v561_v63 = vmax.f32 %v542_v60, 0.0  ;;  %v544_v0 = vpop.f32.mrb[7].mxu1  ;;  %650 = vmatprep.mubr.f32.mxu0 %v2431_v10  ;;  %v552_v13 = vmax.f32 %v461_v61, 0.0 }
 0x19a   :  { %v562_v2 = vmax.f32 %v544_v0, 0.0 }
 0x19b   :  { %v2173_v3 = vpack.c.bf16 %v561_v63, %v553_v62  ;;  %v2291_v5 = vpack.i.bf16 %v561_v63, %v553_v62  ;;  %v465_v6 = vpop.f32.mrb[6].mxu0  ;;  %970 = vrot.lane.b32.xlu1 %v2528_v21, %s2433_s8 }
 0x19c   :  { %v559_v7 = vmax.f32 %v465_v6, 0.0  ;;  %v467_v9 = vpop.f32.mrb[7].mxu0  ;;  %v2171_v11 = vpack.c.bf16 %v562_v2, %v554_v1  ;;  %v2296_v12 = vpack.i.bf16 %v562_v2, %v554_v1  ;;  %2128 = vmatmul.mubr.msk.f32.gmra.mrb[10].mxu0 %vm575_vm8, %v574_v56 }
 0x19d   :  { %2292 = vrot.lane.b32.xlu0 %v2291_v5, %s2430_s7  ;;  %v560_v14 = vmax.f32 %v467_v9, 0.0  ;;  %798 = vmatprep.mubr.f32.mxu0 %v2431_v10 }
 0x19e   :  { %v2169_v15 = vpack.c.bf16 %v559_v7, %v551_v4  ;;  %2172 = vmatprep.subr.bf16.mxu1 %v2171_v11  ;;  %v2301_v16 = vpack.i.bf16 %v559_v7, %v551_v4 }
 0x19f   :  { %2174 = vmatpush1.bf16.msra.mxu1 %v2173_v3  ;;  %v2311_v17 = vpack.i.bf16 %v560_v14, %v552_v13  ;;  %v2167_v18 = vpack.c.bf16 %v560_v14, %v552_v13 }
 0x1a1   :  { %2297 = vrot.lane.b32.xlu0 %v2296_v12, %s2430_s7  ;;  %2312 = vrot.lane.b32.xlu1 %v2311_v17, %s2430_s7 }
 0x1a2   :  { %2168 = vmatprep.subr.bf16.mxu0 %v2167_v18  ;;  %2133 = vmatmul.mubr.msk.f32.vlgmr.msra.gmra.mrb[12].mxu1 %vm575_vm8, %v572_v45 }
 0x1a3   :  { %2170 = vmatpush1.bf16.msra.mxu0 %v2169_v15  ;;  %881 = vmatprep.mubr.f32.mxu1 %v2431_v10 }
 0x1a5   :  { %2302 = vrot.lane.b32.xlu0 %v2301_v16, %s2430_s7  ;;  %2317 = vrot.lane.b32.xlu1 %v2301_v16, %s2429_s6 }
 0x1a6   :  { %2131 = vmatmul.mubr.msk.f32.vlgmr.msra.gmra.mrb[12].mxu0 %vm575_vm8, %v572_v45  ;;  %2134 = vmatmul.mubr.msk.f32.gmra.mrb[14].mxu1 %vm575_vm8, %v574_v56 }
 0x1a7   :  { %804 = vmatprep.mubr.f32.mxu0 %v2431_v10  ;;  %1117 = vmatprep.mubr.f32.mxu1 %v2431_v10 }
 0x1a9   :  { %2307 = vrot.lane.b32.xlu0 %v2649_v42, %s2429_s6  ;;  %2327 = vrot.lane.b32.xlu1 %v2286_v54, %s2429_s6 }
 0x1aa   :  { %2132 = vmatmul.mubr.msk.f32.gmra.mrb[14].mxu0 %vm575_vm8, %v574_v56 }
 0x1ab   :  { %1040 = vmatprep.mubr.f32.mxu0 %v2431_v10 }
 0x1ad   :  { %2322 = vrot.lane.b32.xlu0 %v2647_v39, %s2429_s6  ;;  %1380 = vrot.lane.b32.xlu1 %v2526_v20, %s2434_s9 }
 0x1b1   :  { %2332 = vrot.lane.b32.xlu0 %v2276_v53, %s2429_s6  ;;  %2337 = vrot.lane.b32.xlu1 %v2291_v5, %s2429_s6 }
 0x1b5   :  { %2342 = vrot.lane.b32.xlu0 %v2296_v12, %s2429_s6  ;;  %1382 = vrot.lane.b32.xlu1 %v2528_v21, %s2434_s9 }
 0x1b9   :  { %2347 = vrot.lane.b32.xlu0 %v2311_v17, %s2429_s6  ;;  %568 = vperm.xlu1 %2352, %v2528_v21  }
 0x1bd   :  { %564 = vperm.xlu0 %2351, %v2526_v20  }
 0x1fd   :  { %v2273_v27 = vpop.permute.xlu0 %2272 }
 0x1fe   :  { %v2275_v8 = vunpack.i.h.bf16 %v2273_v27  ;;  %v2274_v19 = vunpack.i.l.bf16 %v2273_v27 }
 0x205   :  { %v2278_v28 = vpop.permute.xlu1 %2277 }
 0x206   :  { %v2280_v29 = vunpack.i.h.bf16 %v2278_v28  ;;  %v2279_v30 = vunpack.i.l.bf16 %v2278_v28  ;;  %v2288_v25 = vpop.permute.xlu0 %2287 }
 0x207   :  { %v2290_v26 = vunpack.i.h.bf16 %v2288_v25  ;;  %v2289_v31 = vunpack.i.l.bf16 %v2288_v25 }
 0x209   :  { %v2283_v32 = vpop.permute.xlu1 %2282  ;;  %v932_v33 = vsel %vm48_vm0, %v2279_v30, %v2289_v31  ;;  %v933_v21 = vsel %vm48_vm0, %v2280_v29, %v2290_v26  ;;  %v931_v36 = vsel %vm48_vm0, %v2290_v26, %v2275_v8  ;;  %v930_v37 = vsel %vm48_vm0, %v2289_v31, %v2274_v19 }
 0x20a   :  { %v2285_v34 = vunpack.i.h.bf16 %v2283_v32  ;;  %v2284_v20 = vunpack.i.l.bf16 %v2283_v32  ;;  %v2175_v35 = vpack.c.bf16 %v933_v21, %v932_v33  ;;  %v2182_v42 = vpack.c.bf16 %v931_v36, %v930_v37 }
 0x20c   :  { %2176 = vmatprep.subr.bf16.mxu0 %v2175_v35  ;;  %v928_v38 = vsel %vm48_vm0, %v2274_v19, %v2284_v20  ;;  %v929_v39 = vsel %vm48_vm0, %v2275_v8, %v2285_v34 }
 0x20d   :  { %v2707_v40 = vpop.permute.xlu1 %970  ;;  %v2180_v41 = vpack.c.bf16 %v929_v39, %v928_v38 }
 0x20f   :  { %v2293_v43 = vpop.permute.xlu0 %2292  ;;  %2181 = vmatprep.subr.bf16.mxu1 %v2180_v41 }
 0x210   :  { %2183 = vmatpush1.bf16.msra.mxu1 %v2182_v42  ;;  %v2295_v44 = vunpack.i.h.bf16 %v2293_v43  ;;  %v2294_v45 = vunpack.i.l.bf16 %v2293_v43 }
 0x213   :  { %v2298_v46 = vpop.permute.xlu0 %2297  ;;  %v2313_v48 = vpop.permute.xlu1 %2312  ;;  %2141 = vmatmul.mubr.msk.f32.vlgmr.msra.gmra.mrb[8].mxu1 %vm575_vm8, %v2693_v24 }
 0x214   :  { %v2300_v50 = vunpack.i.h.bf16 %v2298_v46  ;;  %v2299_v51 = vunpack.i.l.bf16 %v2298_v46  ;;  %v2315_v52 = vunpack.i.h.bf16 %v2313_v48  ;;  %v2314_v53 = vunpack.i.l.bf16 %v2313_v48  ;;  %1123 = vmatprep.mubr.f32.mxu1 %v2431_v10 }
 0x216   :  { %v934_v54 = vsel %vm48_vm0, %v2299_v51, %v2279_v30  ;;  %v935_v55 = vsel %vm48_vm0, %v2300_v50, %v2280_v29  ;;  %v923_v56 = vsel %vm48_vm0, %v2315_v52, %v2295_v44  ;;  %v922_v57 = vsel %vm48_vm0, %v2314_v53, %v2294_v45 }
 0x217   :  { %v2177_v58 = vpack.c.bf16 %v935_v55, %v934_v54  ;;  %v2303_v59 = vpop.permute.xlu0 %2302  ;;  %v2729_v60 = vpop.permute.xlu1 %2317  ;;  %2142 = vmatmul.mubr.msk.f32.gmra.mrb[10].mxu1 %vm575_vm8, %v2707_v40  ;;  %v920_v61 = vsel %vm48_vm0, %v2294_v45, %v2299_v51  ;;  %v921_v62 = vsel %vm48_vm0, %v2295_v44, %v2300_v50  ;;  %v2190_v63 = vpack.c.bf16 %v923_v56, %v922_v57 }
 0x218   :  { %v2305_v0 = vunpack.i.h.bf16 %v2303_v59  ;;  %v2304_v1 = vunpack.i.l.bf16 %v2303_v59  ;;  %1271 = vmatprep.mubr.f32.mxu1 %v2431_v10  ;;  %v2188_v2 = vpack.c.bf16 %v921_v62, %v920_v61  ;;  %v2320_v13 = vunpack.i.h.bf16 %v2729_v60 }
 0x219   :  { %2179 = vmatpush1.bf16.msk.msra.mxu0 %vm2178_vm10, %v2177_v58  ;;  %v2319_v14 = vunpack.i.l.bf16 %v2729_v60 }
 0x21a   :  { %v926_v3 = vsel %vm48_vm0, %v2284_v20, %v2304_v1  ;;  %v927_v4 = vsel %vm48_vm0, %v2285_v34, %v2305_v0  ;;  %v924_v5 = vsel %vm48_vm0, %v2304_v1, %v2314_v53  ;;  %v925_v6 = vsel %vm48_vm0, %v2305_v0, %v2315_v52  ;;  %2189 = vmatprep.subr.bf16.mxu1 %v2188_v2 }
 0x21b   :  { %v2186_v7 = vpack.c.bf16 %v927_v4, %v926_v3  ;;  %v2308_v9 = vpop.permute.xlu0 %2307  ;;  %v2328_v11 = vpop.permute.xlu1 %2327  ;;  %v2184_v12 = vpack.c.bf16 %v925_v6, %v924_v5  ;;  %2191 = vmatpush1.bf16.msra.mxu1 %v2190_v63  ;;  %vm1969_vm0 = vcmp.lt.s32.totalorder %v2532_v22, 64 }
 0x21c   :  { %v2310_v15 = vunpack.i.h.bf16 %v2308_v9  ;;  %v2309_v16 = vunpack.i.l.bf16 %v2308_v9  ;;  %2139 = vmatmul.mubr.msk.f32.vlgmr.msra.gmra.mrb[8].mxu0 %vm575_vm8, %v2693_v24  ;;  %v2330_v29 = vunpack.i.h.bf16 %v2328_v11  ;;  %v2329_v30 = vunpack.i.l.bf16 %v2328_v11 }
 0x21d   :  { %2185 = vmatprep.subr.bf16.mxu0 %v2184_v12  ;;  %1046 = vmatprep.mubr.f32.mxu0 %v2431_v10 }
 0x21e   :  { %2187 = vmatpush1.bf16.msra.mxu0 %v2186_v7  ;;  %v1338_v17 = vsel %vm153_vm1, %v2309_v16, %v2319_v14  ;;  %v1339_v18 = vsel %vm153_vm1, %v2310_v15, %v2320_v13  ;;  %2145 = vmatmul.mubr.msk.f32.vlgmr.msra.gmra.mrb[12].mxu1 %vm575_vm8, %v2693_v24 }
 0x21f   :  { %v2323_v23 = vpop.permute.xlu0 %2322  ;;  %v2761_v27 = vpop.permute.xlu1 %1380  ;;  %v2196_v28 = vpack.c.bf16 %v1339_v18, %v1338_v17  ;;  %1277 = vmatprep.mubr.f32.mxu1 %v2431_v10 }
 0x220   :  { %v2325_v25 = vunpack.i.h.bf16 %v2323_v23  ;;  %v2324_v26 = vunpack.i.l.bf16 %v2323_v23  ;;  %2140 = vmatmul.mubr.msk.f32.gmra.mrb[10].mxu0 %vm575_vm8, %v2707_v40 }
 0x221   :  { %2197 = vmatprep.subr.bf16.mxu1 %v2196_v28  ;;  %1194 = vmatprep.mubr.f32.mxu0 %v2431_v10 }
 0x222   :  { %v1340_v31 = vsel %vm153_vm1, %v2324_v26, %v2309_v16  ;;  %v1341_v8 = vsel %vm153_vm1, %v2325_v25, %v2310_v15  ;;  %v1342_v19 = vsel %vm153_vm1, %v2329_v30, %v2324_v26  ;;  %v1343_v32 = vsel %vm153_vm1, %v2330_v29, %v2325_v25  ;;  %2146 = vmatmul.mubr.msk.f32.gmra.mrb[14].mxu1 %vm575_vm8, %v2707_v40 }
 0x223   :  { %v2198_v33 = vpack.c.bf16 %v1341_v8, %v1340_v31  ;;  %v2333_v21 = vpop.permute.xlu0 %2332  ;;  %v2192_v34 = vpack.c.bf16 %v1343_v32, %v1342_v19  ;;  %1529 = vmatprep.mubr.f32.mxu1 %v2431_v10  ;;  %v2338_v36 = vpop.permute.xlu1 %2337 }
 0x224   :  { %v2335_v20 = vunpack.i.h.bf16 %v2333_v21  ;;  %v2334_v35 = vunpack.i.l.bf16 %v2333_v21  ;;  %2143 = vmatmul.mubr.msk.f32.vlgmr.msra.gmra.mrb[12].mxu0 %vm575_vm8, %v2693_v24  ;;  %v2340_v24 = vunpack.i.h.bf16 %v2338_v36  ;;  %v2339_v43 = vunpack.i.l.bf16 %v2338_v36 }
 0x225   :  { %2193 = vmatprep.subr.bf16.mxu0 %v2192_v34  ;;  %2199 = vmatpush1.bf16.msra.mxu1 %v2198_v33 }
 0x226   :  { %v1344_v37 = vsel %vm153_vm1, %v2334_v35, %v2329_v30  ;;  %v1345_v38 = vsel %vm153_vm1, %v2335_v20, %v2330_v29  ;;  %1200 = vmatprep.mubr.f32.mxu0 %v2431_v10 }
 0x227   :  { %v2194_v39 = vpack.c.bf16 %v1345_v38, %v1344_v37  ;;  %v2343_v41 = vpop.permute.xlu0 %2342  ;;  %v1383_v46 = vpop.permute.xlu1 %1382 }
 0x228   :  { %v2345_v44 = vunpack.i.h.bf16 %v2343_v41  ;;  %v2344_v45 = vunpack.i.l.bf16 %v2343_v41  ;;  %2144 = vmatmul.mubr.msk.f32.gmra.mrb[14].mxu0 %vm575_vm8, %v2707_v40  ;;  %2149 = vmatmul.mubr.msk.f32.vlgmr.msra.gmra.mrb[8].mxu1 %vm575_vm8, %v2761_v27 }
 0x229   :  { %2195 = vmatpush1.bf16.msra.mxu0 %v2194_v39  ;;  %1452 = vmatprep.mubr.f32.mxu0 %v2431_v10 }
 0x22a   :  { %v1332_v48 = vsel %vm153_vm1, %v2339_v43, %v2344_v45  ;;  %v1333_v49 = vsel %vm153_vm1, %v2340_v24, %v2345_v44  ;;  %v1346_v50 = vsel %vm153_vm1, %v2344_v45, %v2334_v35  ;;  %v1347_v51 = vsel %vm153_vm1, %v2345_v44, %v2335_v20  ;;  %1535 = vmatprep.mubr.f32.mxu1 %v2431_v10 }
 0x22b   :  { %v2204_v40 = vpack.c.bf16 %v1347_v51, %v1346_v50  ;;  %v2207_v52 = vpack.c.bf16 %v1333_v49, %v1332_v48  ;;  %v2348_v53 = vpop.permute.xlu0 %2347 }
 0x22c   :  { %v2350_v54 = vunpack.i.h.bf16 %v2348_v53  ;;  %v2349_v55 = vunpack.i.l.bf16 %v2348_v53  ;;  %2147 = vmatmul.mubr.msk.f32.vlgmr.msra.gmra.mrb[8].mxu0 %vm575_vm8, %v2761_v27  ;;  %2150 = vmatmul.mubr.msk.f32.gmra.mrb[10].mxu1 %vm575_vm8, %v1383_v46 }
 0x22d   :  { %2206 = vmatprep.subr.msk.bf16.mxu1 %vm2205_vm12, %v2204_v40  ;;  %1458 = vmatprep.mubr.f32.mxu0 %v2431_v10 }
 0x22e   :  { %v1336_v56 = vsel %vm153_vm1, %v2319_v14, %v2349_v55  ;;  %v1337_v57 = vsel %vm153_vm1, %v2320_v13, %v2350_v54  ;;  %2208 = vmatpush1.bf16.msra.mxu1 %v2207_v52  ;;  %1683 = vmatprep.mubr.f32.mxu1 %v2431_v10  ;;  %v1334_v58 = vsel %vm153_vm1, %v2349_v55, %v2339_v43 }
 0x22f   :  { %v2202_v59 = vpack.c.bf16 %v1337_v57, %v1336_v56  ;;  %v1335_v61 = vsel %vm153_vm1, %v2350_v54, %v2340_v24 }
 0x230   :  { %2148 = vmatmul.mubr.msk.f32.gmra.mrb[10].mxu0 %vm575_vm8, %v1383_v46  ;;  %v2200_v62 = vpack.c.bf16 %v1335_v61, %v1334_v58 }
 0x231   :  { %2157 = vmatmul.mubr.msk.f32.vlgmr.msra.gmra.mrb[12].mxu1 %vm575_vm8, %v2761_v27  ;;  %1606 = vmatprep.mubr.f32.mxu0 %v2431_v10 }
 0x232   :  { %2201 = vmatprep.subr.bf16.mxu0 %v2200_v62  ;;  %1689 = vmatprep.mubr.f32.mxu1 %v2431_v10 }
 0x233   :  { %2203 = vmatpush1.bf16.msra.mxu0 %v2202_v59 }
 0x235   :  { %2158 = vmatmul.mubr.msk.f32.gmra.mrb[14].mxu1 %vm575_vm8, %v1383_v46 }
 0x236   :  { %2151 = vmatmul.mubr.msk.f32.vlgmr.msra.gmra.mrb[12].mxu0 %vm575_vm8, %v2761_v27 }
 0x237   :  { %1612 = vmatprep.mubr.f32.mxu0 %v2431_v10 }
 0x238   :  { %v569_v2 = vpop.permute.xlu1 %568 }
 0x23a   :  { %2152 = vmatmul.mubr.msk.f32.gmra.mrb[14].mxu0 %vm575_vm8, %v1383_v46 }
 0x23c   :  { %v565_v60 = vpop.permute.xlu0 %564 }
 0x2fb   :  { %v1531_v63 = vpop.f32.mrb[8].mxu1 }
 0x2fc   :  { %v2835_v0 = vadd.f32 %v1531_v63, %v565_v60  ;;  %v1533_v1 = vpop.f32.mrb[9].mxu1 }
 0x2fd   :  { %v2838_v4 = vadd.f32 %v1533_v1, %v565_v60 }
 0x2fe   :  { %v1714_v3 = vmax.f32 %v2835_v0, 0.0 }
 0x2ff   :  { %v1454_v5 = vpop.f32.mrb[8].mxu0  ;;  %v1537_v6 = vpop.f32.mrb[10].mxu1  ;;  %v1715_v11 = vmax.f32 %v2838_v4, 0.0 }
 0x300   :  { %v2840_v7 = vadd.f32 %v1537_v6, %v569_v2  ;;  %1736 = vrot.lane.b32.xlu1 %v1714_v3, %s2429_s6  ;;  %v1456_v10 = vpop.f32.mrb[9].mxu0  ;;  %v1539_v9 = vpop.f32.mrb[11].mxu1  ;;  %v2846_v12 = vadd.f32 %v1454_v5, %v565_v60 }
 0x301   :  { %v2849_v14 = vadd.f32 %v1539_v9, %v569_v2  ;;  %v2856_v27 = vadd.f32 %v1456_v10, %v565_v60 }
 0x302   :  { %v1722_v13 = vmax.f32 %v2840_v7, 0.0  ;;  %v1712_v23 = vmax.f32 %v2846_v12, 0.0 }
 0x303   :  { %v1460_v15 = vpop.f32.mrb[10].mxu0  ;;  %v1723_v28 = vmax.f32 %v2849_v14, 0.0  ;;  %v1713_v31 = vmax.f32 %v2856_v27, 0.0 }
 0x304   :  { %1740 = vrot.lane.b32.xlu1 %v1715_v11, %s2429_s6  ;;  %1738 = vrot.lane.b32.xlu0 %v1722_v13, %s2429_s6  ;;  %v1462_v16 = vpop.f32.mrb[11].mxu0  ;;  %v1685_v17 = vpop.f32.mrb[12].mxu1  ;;  %v2859_v29 = vadd.f32 %v1460_v15, %v569_v2 }
 0x305   :  { %v1687_v18 = vpop.f32.mrb[13].mxu1  ;;  %v2867_v19 = vadd.f32 %v1462_v16, %v569_v2  ;;  %v2891_v24 = vadd.f32 %v1685_v17, %v565_v60 }
 0x306   :  { %v1720_v8 = vmax.f32 %v2859_v29, 0.0  ;;  %v2869_v32 = vadd.f32 %v1687_v18, %v565_v60 }
 0x307   :  { %v1721_v34 = vmax.f32 %v2867_v19, 0.0  ;;  %v1718_v46 = vmax.f32 %v2891_v24, 0.0 }
 0x308   :  { %1742 = vrot.lane.b32.xlu0 %v1723_v28, %s2429_s6  ;;  %v1691_v30 = vpop.f32.mrb[14].mxu1  ;;  %1728 = vrot.lane.b32.xlu1 %v1712_v23, %s2429_s6  ;;  %v1719_v20 = vmax.f32 %v2869_v32, 0.0 }
 0x309   :  { %v1608_v25 = vpop.f32.mrb[12].mxu0  ;;  %v1693_v26 = vpop.f32.mrb[15].mxu1  ;;  %v2904_v48 = vadd.f32 %v1691_v30, %v569_v2 }
 0x30a   :  { %v1610_v33 = vpop.f32.mrb[13].mxu0  ;;  %v2875_v35 = vadd.f32 %v1608_v25, %v565_v60  ;;  %v2877_v36 = vadd.f32 %v1693_v26, %v569_v2 }
 0x30b   :  { %v2882_v39 = vadd.f32 %v1610_v33, %v565_v60  ;;  %v1726_v50 = vmax.f32 %v2904_v48, 0.0 }
 0x30c   :  { %1732 = vrot.lane.b32.xlu1 %v1713_v31, %s2429_s6  ;;  %1730 = vrot.lane.b32.xlu0 %v1720_v8, %s2429_s6  ;;  %v1716_v38 = vmax.f32 %v2875_v35, 0.0  ;;  %v1727_v41 = vmax.f32 %v2877_v36, 0.0 }
 0x30d   :  { %v1614_v21 = vpop.f32.mrb[14].mxu0  ;;  %v1717_v43 = vmax.f32 %v2882_v39, 0.0 }
 0x30e   :  { %v1616_v37 = vpop.f32.mrb[15].mxu0  ;;  %v2885_v42 = vadd.f32 %v1614_v21, %v569_v2 }
 0x30f   :  { %v2895_v45 = vadd.f32 %v1616_v37, %v569_v2 }
 0x310   :  { %1756 = vrot.lane.b32.xlu1 %v1719_v20, %s2429_s6  ;;  %1734 = vrot.lane.b32.xlu0 %v1721_v34, %s2429_s6  ;;  %v1724_v44 = vmax.f32 %v2885_v42, 0.0 }
 0x311   :  { %v1725_v49 = vmax.f32 %v2895_v45, 0.0 }
 0x314   :  { %1758 = vrot.lane.b32.xlu0 %v1727_v41, %s2429_s6  ;;  %1744 = vrot.lane.b32.xlu1 %v1716_v38, %s2429_s6 }
 0x318   :  { %1748 = vrot.lane.b32.xlu1 %v1717_v43, %s2429_s6  ;;  %1746 = vrot.lane.b32.xlu0 %v1724_v44, %s2429_s6 }
 0x31c   :  { %1752 = vrot.lane.b32.xlu1 %v1718_v46, %s2429_s6  ;;  %1750 = vrot.lane.b32.xlu0 %v1725_v49, %s2429_s6 }
 0x320   :  { %1754 = vrot.lane.b32.xlu0 %v1726_v50, %s2429_s6 }
 0x372   :  { %v1737_v51 = vpop.permute.xlu1 %1736 }
 0x376   :  { %v1741_v40 = vpop.permute.xlu1 %1740  ;;  %v1739_v52 = vpop.permute.xlu0 %1738 }
 0x377   :  { %v1768_v53 = vsel %vm153_vm1, %v1737_v51, %v1741_v40 }
 0x378   :  { %v2921_v54 = vmax.f32 %v1714_v3, %v1768_v53 }
 0x37a   :  { %v1743_v55 = vpop.permute.xlu0 %1742  ;;  %v1729_v56 = vpop.permute.xlu1 %1728  ;;  %1840 = vrot.lane.b32.xlu1 %v2921_v54, %s2436_s10 }
 0x37b   :  { %v1769_v57 = vsel %vm153_vm1, %v1739_v52, %v1743_v55 }
 0x37c   :  { %v2927_v58 = vmax.f32 %v1722_v13, %v1769_v57 }
 0x37e   :  { %v1733_v59 = vpop.permute.xlu1 %1732  ;;  %v1731_v61 = vpop.permute.xlu0 %1730  ;;  %1842 = vrot.lane.b32.xlu0 %v2927_v58, %s2436_s10 }
 0x37f   :  { %v1772_v62 = vsel %vm153_vm1, %v1729_v56, %v1733_v59  ;;  %v1770_v63 = vsel %vm153_vm1, %v1733_v59, %v1737_v51 }
 0x380   :  { %v1816_v60 = vmax.f32 %v1712_v23, %v1772_v62  ;;  %v1817_v5 = vmax.f32 %v1713_v31, %v1770_v63 }
 0x382   :  { %v1757_v0 = vpop.permute.xlu1 %1756  ;;  %v1735_v1 = vpop.permute.xlu0 %1734  ;;  %1832 = vrot.lane.b32.xlu1 %v1816_v60, %s2436_s10 }
 0x383   :  { %v1774_v2 = vsel %vm153_vm1, %v1757_v0, %v1729_v56  ;;  %v1773_v3 = vsel %vm153_vm1, %v1731_v61, %v1735_v1  ;;  %v1771_v10 = vsel %vm153_vm1, %v1735_v1, %v1739_v52 }
 0x384   :  { %v1824_v6 = vmax.f32 %v1720_v8, %v1773_v3  ;;  %v1807_v7 = vsel %vm1783_vm13, %v1774_v2, 0.0  ;;  %v1825_v16 = vmax.f32 %v1721_v34, %v1771_v10 }
 0x385   :  { %v1823_v15 = vmax.f32 %v1719_v20, %v1807_v7 }
 0x386   :  { %v1759_v9 = vpop.permute.xlu0 %1758  ;;  %v1745_v12 = vpop.permute.xlu1 %1744  ;;  %1836 = vrot.lane.b32.xlu1 %v1817_v5, %s2436_s10  ;;  %1834 = vrot.lane.b32.xlu0 %v1824_v6, %s2436_s10 }
 0x387   :  { %v1775_v13 = vsel %vm153_vm1, %v1759_v9, %v1731_v61  ;;  %v1766_v18 = vsel %vm153_vm1, %v1741_v40, %v1745_v12 }
 0x388   :  { %v1815_v17 = vsel %vm1783_vm13, %v1775_v13, 0.0  ;;  %v2957_v30 = vmax.f32 %v1715_v11, %v1766_v18 }
 0x389   :  { %v1831_v29 = vmax.f32 %v1727_v41, %v1815_v17 }
 0x38a   :  { %1860 = vrot.lane.b32.xlu1 %v1823_v15, %s2436_s10  ;;  %v1749_v23 = vpop.permute.xlu1 %1748  ;;  %v1747_v27 = vpop.permute.xlu0 %1746  ;;  %1838 = vrot.lane.b32.xlu0 %v1825_v16, %s2436_s10 }
 0x38b   :  { %v1764_v25 = vsel %vm153_vm1, %v1745_v12, %v1749_v23  ;;  %v1767_v26 = vsel %vm153_vm1, %v1743_v55, %v1747_v27 }
 0x38c   :  { %v2968_v19 = vmax.f32 %v1716_v38, %v1764_v25  ;;  %v2972_v4 = vmax.f32 %v1723_v28, %v1767_v26 }
 0x38e   :  { %1844 = vrot.lane.b32.xlu1 %v2957_v30, %s2436_s10  ;;  %v1753_v31 = vpop.permute.xlu1 %1752  ;;  %1862 = vrot.lane.b32.xlu0 %v1831_v29, %s2436_s10  ;;  %v1751_v8 = vpop.permute.xlu0 %1750 }
 0x38f   :  { %v1762_v11 = vsel %vm153_vm1, %v1749_v23, %v1753_v31  ;;  %v1765_v32 = vsel %vm153_vm1, %v1747_v27, %v1751_v8  ;;  %v1760_v28 = vsel %vm153_vm1, %v1753_v31, %v1757_v0 }
 0x390   :  { %v2984_v21 = vmax.f32 %v1717_v43, %v1762_v11  ;;  %v2988_v14 = vmax.f32 %v1724_v44, %v1765_v32  ;;  %v3000_v20 = vmax.f32 %v1718_v46, %v1760_v28 }
 0x392   :  { %1848 = vrot.lane.b32.xlu1 %v2968_v19, %s2436_s10  ;;  %1846 = vrot.lane.b32.xlu0 %v2972_v4, %s2436_s10  ;;  %v1755_v33 = vpop.permute.xlu0 %1754 }
 0x393   :  { %v1763_v34 = vsel %vm153_vm1, %v1751_v8, %v1755_v33  ;;  %v1761_v36 = vsel %vm153_vm1, %v1755_v33, %v1759_v9  ;;  %vm1993_vm1 = vcmp.lt.s32.totalorder %v2566_v47, 960 }
 0x394   :  { %v3004_v35 = vmax.f32 %v1725_v49, %v1763_v34  ;;  %v3014_v37 = vmax.f32 %v1726_v50, %v1761_v36 }
 0x396   :  { %1852 = vrot.lane.b32.xlu1 %v2984_v21, %s2436_s10  ;;  %1850 = vrot.lane.b32.xlu0 %v2988_v14, %s2436_s10 }
 0x39a   :  { %1856 = vrot.lane.b32.xlu1 %v3000_v20, %s2436_s10  ;;  %1854 = vrot.lane.b32.xlu0 %v3004_v35, %s2436_s10 }
 0x39e   :  { %1858 = vrot.lane.b32.xlu0 %v3014_v37, %s2436_s10 }
 0x3ec   :  { %v1841_v38 = vpop.permute.xlu1 %1840 }
 0x3f0   :  { %v1843_v39 = vpop.permute.xlu0 %1842 }
 0x3f4   :  { %v1833_v41 = vpop.permute.xlu1 %1832 }
 0x3f8   :  { %v1837_v42 = vpop.permute.xlu1 %1836  ;;  %v1835_v24 = vpop.permute.xlu0 %1834 }
 0x3f9   :  { %v1877_v43 = vsel %vm1864_vm14, %v1833_v41, %v1837_v42  ;;  %v1875_v45 = vsel %vm1864_vm14, %v1837_v42, %v1841_v38 }
 0x3fa   :  { %v3021_v44 = vmax.f32 %v1816_v60, %v1877_v43  ;;  %v3032_v51 = vmax.f32 %v1817_v5, %v1875_v45 }
 0x3fc   :  { %1937 = vrot.lane.b32.xlu1 %v3021_v44, %s2437_s11  ;;  %v1861_v46 = vpop.permute.xlu1 %1860  ;;  %v1839_v48 = vpop.permute.xlu0 %1838 }
 0x3fd   :  { %v1879_v49 = vsel %vm1864_vm14, %v1861_v46, %v1833_v41  ;;  %v1878_v50 = vsel %vm1864_vm14, %v1835_v24, %v1839_v48  ;;  %v1876_v53 = vsel %vm1864_vm14, %v1839_v48, %v1843_v39 }
 0x3fe   :  { %v3034_v40 = vmax.f32 %v1824_v6, %v1878_v50  ;;  %v1912_v52 = vsel %vm1888_vm15, %v1879_v49, 0.0  ;;  %v3048_v61 = vmax.f32 %v1825_v16, %v1876_v53 }
 0x3ff   :  { %v3046_v59 = vmax.f32 %v1823_v15, %v1912_v52 }
 0x400   :  { %1941 = vrot.lane.b32.xlu1 %v3032_v51, %s2437_s11  ;;  %v1845_v55 = vpop.permute.xlu1 %1844  ;;  %1939 = vrot.lane.b32.xlu0 %v3034_v40, %s2437_s11  ;;  %v1863_v56 = vpop.permute.xlu0 %1862 }
 0x401   :  { %v1880_v57 = vsel %vm1864_vm14, %v1863_v56, %v1835_v24  ;;  %v1873_v62 = vsel %vm1864_vm14, %v1841_v38, %v1845_v55 }
 0x402   :  { %v1920_v60 = vsel %vm1888_vm15, %v1880_v57, 0.0  ;;  %v3059_v1 = vmax.f32 %v2921_v54, %v1873_v62 }
 0x403   :  { %v3061_v2 = vmax.f32 %v1831_v29, %v1920_v60 }
 0x404   :  { %1965 = vrot.lane.b32.xlu1 %v3046_v59, %s2437_s11  ;;  %v1849_v63 = vpop.permute.xlu1 %1848  ;;  %1943 = vrot.lane.b32.xlu0 %v3048_v61, %s2437_s11  ;;  %v1847_v0 = vpop.permute.xlu0 %1846 }
 0x405   :  { %v1871_v3 = vsel %vm1864_vm14, %v1845_v55, %v1849_v63  ;;  %v1874_v5 = vsel %vm1864_vm14, %v1843_v39, %v1847_v0 }
 0x406   :  { %v3072_v10 = vmax.f32 %v2957_v30, %v1871_v3  ;;  %v3075_v54 = vmax.f32 %v2927_v58, %v1874_v5 }
 0x408   :  { %1945 = vrot.lane.b32.xlu1 %v3059_v1, %s2437_s11  ;;  %v1853_v6 = vpop.permute.xlu1 %1852  ;;  %1967 = vrot.lane.b32.xlu0 %v3061_v2, %s2437_s11  ;;  %v1851_v7 = vpop.permute.xlu0 %1850 }
 0x409   :  { %v1869_v9 = vsel %vm1864_vm14, %v1849_v63, %v1853_v6  ;;  %v1872_v12 = vsel %vm1864_vm14, %v1847_v0, %v1851_v7 }
 0x40a   :  { %v3086_v16 = vmax.f32 %v2968_v19, %v1869_v9  ;;  %v3089_v58 = vmax.f32 %v2972_v4, %v1872_v12 }
 0x40c   :  { %1949 = vrot.lane.b32.xlu1 %v3072_v10, %s2437_s11  ;;  %v1857_v13 = vpop.permute.xlu1 %1856  ;;  %1947 = vrot.lane.b32.xlu0 %v3075_v54, %s2437_s11  ;;  %v1855_v15 = vpop.permute.xlu0 %1854 }
 0x40d   :  { %v1867_v17 = vsel %vm1864_vm14, %v1853_v6, %v1857_v13  ;;  %v1870_v18 = vsel %vm1864_vm14, %v1851_v7, %v1855_v15  ;;  %v1865_v30 = vsel %vm1864_vm14, %v1857_v13, %v1861_v46 }
 0x40e   :  { %v1926_v27 = vmax.f32 %v2984_v21, %v1867_v17  ;;  %v3101_v29 = vmax.f32 %v2988_v14, %v1870_v18  ;;  %v1927_v26 = vmax.f32 %v3000_v20, %v1865_v30 }
 0x410   :  { %1953 = vrot.lane.b32.xlu1 %v3086_v16, %s2437_s11  ;;  %1951 = vrot.lane.b32.xlu0 %v3089_v58, %s2437_s11  ;;  %v1859_v23 = vpop.permute.xlu0 %1858 }
 0x411   :  { %v1868_v25 = vsel %vm1864_vm14, %v1855_v15, %v1859_v23  ;;  %v1866_v8 = vsel %vm1864_vm14, %v1859_v23, %v1863_v56 }
 0x412   :  { %v3112_v31 = vmax.f32 %v3004_v35, %v1868_v25  ;;  %v3120_v19 = vmax.f32 %v3014_v37, %v1866_v8 }
 0x414   :  { %1957 = vrot.lane.b32.xlu1 %v1926_v27, %s2437_s11  ;;  %1955 = vrot.lane.b32.xlu0 %v3101_v29, %s2437_s11 }
 0x418   :  { %1961 = vrot.lane.b32.xlu1 %v1927_v26, %s2437_s11  ;;  %1959 = vrot.lane.b32.xlu0 %v3112_v31, %s2437_s11 }
 0x41c   :  { %1963 = vrot.lane.b32.xlu0 %v3120_v19, %s2437_s11 }
 0x46e   :  { %v1938_v4 = vpop.permute.xlu1 %1937 }
 0x472   :  { %v1942_v11 = vpop.permute.xlu1 %1941  ;;  %v1940_v32 = vpop.permute.xlu0 %1939 }
 0x473   :  { %v1982_v38 = vsel %vm1969_vm0, %v1938_v4, %v1942_v11 }
 0x474   :  { %v2026_v48 = vmax.f32 %v3021_v44, %v1982_v38 }
 0x476   :  { %v1966_v33 = vpop.permute.xlu1 %1965  ;;  %v1944_v21 = vpop.permute.xlu0 %1943 }
 0x477   :  { %v1984_v39 = vsel %vm1969_vm0, %v1966_v33, %v1938_v4  ;;  %v1983_v55 = vsel %vm1969_vm0, %v1940_v32, %v1944_v21 }
 0x478   :  { %v2017_v49 = vsel %vm1993_vm1, %v1984_v39, 0.0 }
 0x479   :  { %v2033_v3 = vmax.f32 %v3046_v59, %v2017_v49 }
 0x47a   :  { %v1946_v14 = vpop.permute.xlu1 %1945  ;;  %v1968_v28 = vpop.permute.xlu0 %1967 }
 0x47b   :  { %v1980_v41 = vsel %vm1969_vm0, %v1942_v11, %v1946_v14  ;;  %v1985_v45 = vsel %vm1969_vm0, %v1968_v28, %v1940_v32 }
 0x47c   :  { %v2027_v50 = vmax.f32 %v3032_v51, %v1980_v41  ;;  %v2025_v56 = vsel %vm1993_vm1, %v1985_v45, 0.0 }
 0x47d   :  { %v2041_v15 = vmax.f32 %v3061_v2, %v2025_v56 }
 0x47e   :  { %v1950_v34 = vpop.permute.xlu1 %1949  ;;  %v1948_v20 = vpop.permute.xlu0 %1947  ;;  %v2062_v9 = vmax.f32 %v2026_v48, %v2027_v50 }
 0x47f   :  { %v1978_v42 = vsel %vm1969_vm0, %v1946_v14, %v1950_v34  ;;  %v1981_v57 = vsel %vm1969_vm0, %v1944_v21, %v1948_v20 }
 0x480   :  { %v2028_v52 = vmax.f32 %v3059_v1, %v1978_v42 }
 0x482   :  { %v1954_v35 = vpop.permute.xlu1 %1953  ;;  %v1952_v36 = vpop.permute.xlu0 %1951 }
 0x483   :  { %v1976_v37 = vsel %vm1969_vm0, %v1950_v34, %v1954_v35  ;;  %v1979_v44 = vsel %vm1969_vm0, %v1948_v20, %v1952_v36 }
 0x484   :  { %v2029_v46 = vmax.f32 %v3072_v10, %v1976_v37  ;;  %v2034_v10 = vmax.f32 %v3034_v40, %v1983_v55  ;;  %v2036_v12 = vmax.f32 %v3075_v54, %v1979_v44 }
 0x486   :  { %v1958_v24 = vpop.permute.xlu1 %1957  ;;  %v1956_v43 = vpop.permute.xlu0 %1955  ;;  %v2063_v63 = vmax.f32 %v2028_v52, %v2029_v46 }
 0x487   :  { %v1977_v47 = vsel %vm1969_vm0, %v1952_v36, %v1956_v43  ;;  %v1974_v53 = vsel %vm1969_vm0, %v1954_v35, %v1958_v24 }
 0x488   :  { %v2037_v51 = vmax.f32 %v3089_v58, %v1977_v47  ;;  %v2030_v5 = vmax.f32 %v3086_v16, %v1974_v53  ;;  %v2035_v58 = vmax.f32 %v3048_v61, %v1981_v57  ;;  %v2080_v59 = vmax.f32 %v2062_v9, %v2063_v63 }
 0x48a   :  { %v1962_v62 = vpop.permute.xlu1 %1961  ;;  %v1960_v60 = vpop.permute.xlu0 %1959  ;;  %v2067_v30 = vmax.f32 %v2036_v12, %v2037_v51 }
 0x48b   :  { %v1970_v0 = vsel %vm1969_vm0, %v1962_v62, %v1966_v33  ;;  %v1972_v1 = vsel %vm1969_vm0, %v1958_v24, %v1962_v62  ;;  %v1975_v13 = vsel %vm1969_vm0, %v1956_v43, %v1960_v60 }
 0x48c   :  { %v2031_v6 = vmax.f32 %v1926_v27, %v1972_v1  ;;  %v2032_v7 = vmax.f32 %v1927_v26, %v1970_v0  ;;  %v2038_v54 = vmax.f32 %v3101_v29, %v1975_v13  ;;  %v2066_v26 = vmax.f32 %v2034_v10, %v2035_v58 }
 0x48e   :  { %v2064_v17 = vmax.f32 %v2030_v5, %v2031_v6  ;;  %v2065_v18 = vmax.f32 %v2032_v7, %v2033_v3  ;;  %v1964_v23 = vpop.permute.xlu0 %1963  ;;  %v2082_v11 = vmax.f32 %v2066_v26, %v2067_v30 }
 0x48f   :  { %v1971_v16 = vsel %vm1969_vm0, %v1964_v23, %v1968_v28  ;;  %v1973_v40 = vsel %vm1969_vm0, %v1960_v60, %v1964_v23 }
 0x490   :  { %v2081_v27 = vmax.f32 %v2064_v17, %v2065_v18  ;;  %v2039_v25 = vmax.f32 %v3112_v31, %v1973_v40  ;;  %v2040_v2 = vmax.f32 %v3120_v19, %v1971_v16 }
 0x492   :  { %v2068_v61 = vmax.f32 %v2038_v54, %v2039_v25  ;;  %v2069_v8 = vmax.f32 %v2040_v2, %v2041_v15  ;;  %v2089_v4 = vmax.f32 %v2080_v59, %v2081_v27 }
 0x494   :  { %v2083_v32 = vmax.f32 %v2068_v61, %v2069_v8  ;;  %2091 = vst [vmem:[#allocation7] sm:$0xff] %v2089_v4 }
 0x496   :  { %v2090_v33 = vmax.f32 %v2082_v11, %v2083_v32 }
 0x498   :  { %2092 = vst [vmem:[#allocation7 + $0x8] sm:$0xff] %v2090_v33 }
 0x499   :  { %2408 = shalt.err (!%p2405_p6)
}
 0x49a   :  { %s2409_s17 = scalar_lea.hbm %s3189_s2, 256 }
 0x49b   :  { %p2410_p7 = scmp.ne.s32.totalorder %s3189_s2, %s2409_s17  ;;  %p2413_p8 = scmp.lt.u32.totalorder %s2409_s17, %s3189_s2 }
 0x49d   :  { %p2415_p9 = pnand %p2413_p8, %p2410_p7 }
 0x49f   :  { %2418 = shalt.err (!%p2415_p9)
}
 0x4a0   :  { %2104 = dma.vmem_to_hbm [thread:$0]  %s2099_s13, 256, %s3189_s2, [#allocation4], %s2427_s0, %s2427_s0, %s2428_s3  }
 0x4a1   :  { %2423 = dma.done.wait [#allocation4], 256  }
 0x4a2   :  { %2424 = vsyncadd [#allocation4], 4294967040 }
 0x4a3   :  { %2108 = vsyncpa [#allocation3], 1 }
 0x4a4   :  { %2109 = vsyncpa [#allocation6], 1 }
 0x4a5   :  { %2110 = vsyncpa [#allocation4], 1 }

</bundles_post_ra>
